<compile_context>
chip_gen: v5e
topology: v5e:2x2
jax: 0.10.0
libtpu: 0.0.40
codegen_flags: <defaults>
</compile_context>

<pallas_src>
import functools

import jax
import jax.numpy as jnp
from jax.experimental import pallas as pl
from jax.experimental.pallas import tpu as pltpu

LANES = 128                      # lane-dense width -> unmasked vector stores
VMEM_LIMIT = 32 * 1024 * 1024    # explicit scoped-VMEM budget (safe on v5e/v6e/v7x)


# ----------------------- fused conv + ReLU + pool kernel ----------------------

def conv_pool_kernel(x_ref, wbd_ref, bt_ref, o_ref, *, H, W, C):
    """One grid step = one full image.

    3x3 'same' conv computed as 9 shifted block-diagonal GEMMs directly on the
    raw padded NHWC image held in VMEM (in-kernel im2col: no patches tensor in
    HBM), + bias + ReLU, then spatial pooling to a single lane-dense row.
    The output row keeps the (w, cout) lane structure; the W-collapse and the
    1/(H*W) averaging are folded into the head weight of the second kernel.
    """
    Lw = wbd_ref.shape[-1]
    x2d = x_ref[0]                                      # [H+2, (W+2)*C] bf16
    acc = jnp.zeros((H, Lw), jnp.float32)
    for idx in range(9):                                # fully unrolled 3x3 offsets
        di, dj = idx // 3, idx % 3
        v = x2d[di:di + H, dj * C:dj * C + W * C]       # [H, W*C] shifted window
        acc = acc + jnp.dot(v, wbd_ref[idx],            # bf16 MXU, f32 accumulate
                            preferred_element_type=jnp.float32)
    feat = jnp.maximum(acc + bt_ref[...], 0.0)          # [H, W*Cout(+pad)] f32

    # Sublane-preserving VPU partial sums first; one cross-sublane (XLU)
    # collapse per image at the very end.
    if H % 8 == 0 and H > 8:
        part = feat[0:8]
        for s in range(1, H // 8):
            part = part + feat[s * 8:(s + 1) * 8]       # pure vreg adds
        pooled = jnp.sum(part, axis=0, keepdims=True)   # single XLU reduce
    else:
        pooled = jnp.sum(feat, axis=0, keepdims=True)

    o_ref[...] = pooled.reshape(o_ref.shape)            # lane-dense [1, 1, Lw]


def conv_pool_forward(x2d, wbd, bt, *, H, W, C):
    """x2d: [B, H+2, (W+2)*C] bf16 padded image; returns pooled rows [B, Lw] f32."""
    B, Hp, WpC = x2d.shape
    Lw = wbd.shape[-1]
    kernel = functools.partial(conv_pool_kernel, H=H, W=W, C=C)
    out = pl.pallas_call(
        kernel,
        out_shape=jax.ShapeDtypeStruct((B, 1, Lw), jnp.float32),
        grid_spec=pltpu.PrefetchScalarGridSpec(
            num_scalar_prefetch=0,
            grid=(B,),                                   # one full image per step
            in_specs=[
                pl.BlockSpec((1, Hp, WpC), lambda b: (b, 0, 0)),    # raw padded image
                pl.BlockSpec((9, W * C, Lw), lambda b: (0, 0, 0)),  # block-diag conv W
                pl.BlockSpec((1, Lw), lambda b: (0, 0)),            # W-tiled conv bias
            ],
            out_specs=pl.BlockSpec((1, 1, Lw), lambda b: (b, 0, 0)),
        ),
        compiler_params=pltpu.CompilerParams(
            dimension_semantics=("parallel",),
            vmem_limit_bytes=VMEM_LIMIT),
    )(x2d, wbd, bt)
    return out[:, 0, :]


# -------------------------- batched classifier head --------------------------

def head_kernel(p_ref, w_ref, b_ref, o_ref):
    """Single step: logits[B, 128] = pooled[B, 128] @ wh_exp[128, 128] + bias."""
    o_ref[...] = (jnp.dot(p_ref[...], w_ref[...],
                          preferred_element_type=jnp.float32) + b_ref[...])


def head_forward(pooled, wh_exp, bh_pad):
    B, Lw = pooled.shape
    Lh = wh_exp.shape[-1]
    return pl.pallas_call(
        head_kernel,
        out_shape=jax.ShapeDtypeStruct((B, Lh), jnp.float32),
        grid_spec=pltpu.PrefetchScalarGridSpec(
            num_scalar_prefetch=0,
            grid=(1,),
            in_specs=[
                pl.BlockSpec((B, Lw), lambda i: (0, 0)),
                pl.BlockSpec((Lw, Lh), lambda i: (0, 0)),
                pl.BlockSpec((1, Lh), lambda i: (0, 0)),
            ],
            out_specs=pl.BlockSpec((B, Lh), lambda i: (0, 0)),
        ),
        compiler_params=pltpu.CompilerParams(vmem_limit_bytes=VMEM_LIMIT),
    )(pooled, wh_exp, bh_pad)


# ------------------------------- JAX wrapper ----------------------------------

def custom_hf_model_forward(x_nchw, params):
    """Equivalent of CustomHuggingFaceModel.forward: returns logits [B, NC]."""
    B, C, H, W = x_nchw.shape
    # NCHW -> NHWC, cast to bf16 early (halves the only HBM stream the conv
    # kernel reads), zero-pad for the 3x3 'same' conv, flatten (W, C) so the
    # kernel can take contiguous-lane shifted windows.
    x_nhwc = jnp.transpose(x_nchw, (0, 2, 3, 1)).astype(jnp.bfloat16)
    xpad = jnp.pad(x_nhwc, ((0, 0), (1, 1), (1, 1), (0, 0)))
    x2d = xpad.reshape(B, H + 2, (W + 2) * C)

    pooled = conv_pool_forward(x2d, params["wbd"], params["bt"], H=H, W=W, C=C)
    logits_pad = head_forward(pooled, params["wh_exp"], params["bh_pad"])
    nc = params["w_head"].shape[1]
    return logits_pad[:, :nc]                            # [B, num_classes]


# --------------------------- deterministic params -----------------------------

def init_params(cin=4, cout=8, num_classes=10, H=16, W=16):
    kp = jax.random.PRNGKey(42)
    k1, k2, k3, k4 = jax.random.split(kp, 4)
    # conv weight in HWIO layout [3, 3, Cin, Cout] (PyTorch [Cout,Cin,3,3] permuted).
    w_conv = 0.1 * jax.random.normal(k1, (3, 3, cin, cout), jnp.float32)
    b_conv = 0.1 * jax.random.normal(k2, (cout,), jnp.float32)
    w_head = 0.1 * jax.random.normal(k3, (cout, num_classes), jnp.float32)
    b_head = 0.1 * jax.random.normal(k4, (num_classes,), jnp.float32)

    Lw = W * cout                                        # lane width of conv output
    Lw_pad = max(LANES, ((Lw + LANES - 1) // LANES) * LANES)
    inv_hw = 1.0 / float(H * W)

    # Block-diagonal conv weights, one [W*C, W*Cout] matrix per 3x3 offset:
    #   wbd[idx][w*C + c, w*Cout + co] = w_conv[di, dj, c, co].
    w_off = w_conv.reshape(9, cin, cout)                 # offset-major (di, dj)
    wbd_core = jnp.stack(
        [jnp.kron(jnp.eye(W, dtype=jnp.float32), w_off[i]) for i in range(9)])
    wbd = jnp.zeros((9, W * cin, Lw_pad), jnp.bfloat16).at[:, :, :Lw].set(
        wbd_core.astype(jnp.bfloat16))

    # Conv bias tiled over the W lane blocks; zero in padded lanes so
    # ReLU(0 + 0) = 0 keeps padded pooled lanes inert.
    bt = jnp.zeros((1, Lw_pad), jnp.float32).at[0, :Lw].set(jnp.tile(b_conv, W))

    # Expanded head weight: folds the W-lane collapse AND the 1/(H*W) average
    # into the GEMM:  wh_exp[w*Cout + co, nc] = w_head[co, nc] / (H*W).
    wh_core = jnp.tile(w_head, (W, 1)) * inv_hw          # [W*Cout, NC]
    wh_exp = jnp.zeros((Lw_pad, LANES), jnp.float32).at[:Lw, :num_classes].set(wh_core)
    bh_pad = jnp.zeros((1, LANES), jnp.float32).at[0, :num_classes].set(b_head)

    return dict(w_conv=w_conv, b_conv=b_conv, w_head=w_head, b_head=b_head,
                wbd=wbd, bt=bt, wh_exp=wh_exp, bh_pad=bh_pad)


def reference_forward(x_nchw, params):
    """Pure-JAX f32 reference (lax conv) for the correctness check."""
    x_nhwc = jnp.transpose(x_nchw, (0, 2, 3, 1)).astype(jnp.float32)
    feat = jax.lax.conv_general_dilated(
        x_nhwc, params["w_conv"], window_strides=(1, 1), padding="SAME",
        dimension_numbers=("NHWC", "HWIO", "NHWC"))
    feat = jnp.maximum(feat + params["b_conv"].reshape(1, 1, 1, -1), 0.0)
    pooled = feat.mean(axis=(1, 2))                      # [B, Cout]
    return pooled @ params["w_head"] + params["b_head"]  # [B, NC]


# ----------------------------------- main --------------------------------------

if __name__ == "__main__":
    B, C, H, W = 2, 4, 16, 16
    x = jax.random.normal(jax.random.PRNGKey(0), (B, C, H, W), jnp.float32)
    params = init_params(cin=C, cout=8, num_classes=10, H=H, W=W)

    logits = jax.jit(custom_hf_model_forward)(x, params)
    jax.block_until_ready(logits)

    ref = reference_forward(x, params)
    assert logits.shape == (B, 10)
    # bf16 MXU inputs vs f32 reference -> loose-ish tolerance.
    assert jnp.allclose(logits, ref, atol=1e-2, rtol=1e-2)

    print("KERNEL_OK")
</pallas_src>

<mosaic_0001>
module attributes {stable_mosaic.version = 11 : i64} {
  func.func @head_kernel(%arg0: i32, %arg1: memref<2x128xf32, #tpu.memory_space<vmem>>, %arg2: memref<128x128xf32, #tpu.memory_space<vmem>>, %arg3: memref<1x128xf32, #tpu.memory_space<vmem>>, %arg4: memref<2x128xf32, #tpu.memory_space<vmem>>) attributes {dimension_semantics = [#tpu.dimension_semantics<arbitrary>], iteration_bounds = array<i64: 1>, scalar_prefetch = 0 : i64, scratch_operands = 0 : i64, tpu.core_type = #tpu.core_type<tc>, window_params = [{pipeline_mode = #tpu.pipeline_mode<synchronous>, transform_indices = @transform_0, window_bounds = array<i64: 2, 128>}, {pipeline_mode = #tpu.pipeline_mode<synchronous>, transform_indices = @transform_1, window_bounds = array<i64: 128, 128>}, {pipeline_mode = #tpu.pipeline_mode<synchronous>, transform_indices = @transform_2, window_bounds = array<i64: 1, 128>}, {pipeline_mode = #tpu.pipeline_mode<synchronous>, transform_indices = @transform_3, window_bounds = array<i64: 2, 128>}]} {
    %c0 = arith.constant 0 : index
    %c0_0 = arith.constant 0 : index
    %0 = vector.load %arg1[%c0, %c0_0] : memref<2x128xf32, #tpu.memory_space<vmem>>, vector<2x128xf32>
    %c0_1 = arith.constant 0 : index
    %c0_2 = arith.constant 0 : index
    %1 = vector.load %arg2[%c0_1, %c0_2] : memref<128x128xf32, #tpu.memory_space<vmem>>, vector<128x128xf32>
    %cst = arith.constant dense<0.000000e+00> : vector<2x128xf32>
    %2 = tpu.matmul %0, %1, %cst {dimension_numbers = #tpu.dot_dimension_numbers<[1], [0], [0], [1], [0, 0, 1, 1], [], []>} : vector<2x128xf32>, vector<128x128xf32>, vector<2x128xf32> -> vector<2x128xf32>
    %c0_3 = arith.constant 0 : index
    %c0_4 = arith.constant 0 : index
    %3 = vector.load %arg3[%c0_3, %c0_4] : memref<1x128xf32, #tpu.memory_space<vmem>>, vector<1x128xf32>
    %4 = vector.broadcast %3 : vector<1x128xf32> to vector<2x128xf32>
    %5 = arith.addf %2, %4 : vector<2x128xf32>
    %c0_5 = arith.constant 0 : index
    %c0_6 = arith.constant 0 : index
    %6 = vector.load %arg4[%c0_5, %c0_6] : memref<2x128xf32, #tpu.memory_space<vmem>>, vector<2x128xf32>
    tpu.vector_store %arg4[%c0_5, %c0_6], %5 {strides = array<i32>} : memref<2x128xf32, #tpu.memory_space<vmem>>, vector<2x128xf32>,
    return
  }
  func.func @transform_0(%arg0: i32) -> (i32, i32) {
    %c0_i32 = arith.constant 0 : i32
    %c0_i32_0 = arith.constant 0 : i32
    %c0_i32_1 = arith.constant 0 : i32
    return %c0_i32, %c0_i32_0 : i32, i32
  }
  func.func @transform_1(%arg0: i32) -> (i32, i32) {
    %c0_i32 = arith.constant 0 : i32
    %c0_i32_0 = arith.constant 0 : i32
    %c0_i32_1 = arith.constant 0 : i32
    return %c0_i32, %c0_i32_0 : i32, i32
  }
  func.func @transform_2(%arg0: i32) -> (i32, i32) {
    %c0_i32 = arith.constant 0 : i32
    %c0_i32_0 = arith.constant 0 : i32
    %c0_i32_1 = arith.constant 0 : i32
    return %c0_i32, %c0_i32_0 : i32, i32
  }
  func.func @transform_3(%arg0: i32) -> (i32, i32) {
    %c0_i32 = arith.constant 0 : i32
    %c0_i32_0 = arith.constant 0 : i32
    %c0_i32_1 = arith.constant 0 : i32
    return %c0_i32, %c0_i32_0 : i32, i32
  }
}

module attributes {stable_mosaic.version = 11 : i64} {
  func.func @conv_pool_kernel(%arg0: i32, %arg1: memref<1x18x72xbf16, #tpu.memory_space<vmem>>, %arg2: memref<9x64x128xbf16, #tpu.memory_space<vmem>>, %arg3: memref<1x128xf32, #tpu.memory_space<vmem>>, %arg4: memref<1x1x128xf32, #tpu.memory_space<vmem>>) attributes {dimension_semantics = [#tpu.dimension_semantics<parallel>], iteration_bounds = array<i64: 2>, scalar_prefetch = 0 : i64, scratch_operands = 0 : i64, tpu.core_type = #tpu.core_type<tc>, window_params = [{transform_indices = @transform_0, window_bounds = array<i64: 1, 18, 72>}, {pipeline_mode = #tpu.pipeline_mode<synchronous>, transform_indices = @transform_1, window_bounds = array<i64: 9, 64, 128>}, {pipeline_mode = #tpu.pipeline_mode<synchronous>, transform_indices = @transform_2, window_bounds = array<i64: 1, 128>}, {transform_indices = @transform_3, window_bounds = array<i64: 1, 1, 128>}]} {
    %c0 = arith.constant 0 : index
    %c0_0 = arith.constant 0 : index
    %c0_1 = arith.constant 0 : index
    %0 = vector.load %arg1[%c0, %c0_0, %c0_1] : memref<1x18x72xbf16, #tpu.memory_space<vmem>>, vector<1x18x72xbf16>
    %1 = vector.shape_cast %0 : vector<1x18x72xbf16> to vector<18x72xbf16>
    %cst = arith.constant 0.000000e+00 : f32
    %2 = vector.broadcast %cst : f32 to vector<16x128xf32>
    %3 = vector.extract_strided_slice %1 {offsets = [0, 0], sizes = [16, 64], strides = [1, 1]} : vector<18x72xbf16> to vector<16x64xbf16>
    %c0_2 = arith.constant 0 : index
    %c0_3 = arith.constant 0 : index
    %c0_4 = arith.constant 0 : index
    %4 = vector.load %arg2[%c0_2, %c0_3, %c0_4] : memref<9x64x128xbf16, #tpu.memory_space<vmem>>, vector<1x64x128xbf16>
    %5 = vector.shape_cast %4 : vector<1x64x128xbf16> to vector<64x128xbf16>
    %cst_5 = arith.constant dense<0.000000e+00> : vector<16x128xf32>
    %6 = tpu.matmul %3, %5, %cst_5 {dimension_numbers = #tpu.dot_dimension_numbers<[1], [0], [0], [1], [0, 0, 1, 1], [], []>} : vector<16x64xbf16>, vector<64x128xbf16>, vector<16x128xf32> -> vector<16x128xf32>
    %7 = arith.addf %2, %6 : vector<16x128xf32>
    %8 = vector.extract_strided_slice %1 {offsets = [0, 4], sizes = [16, 64], strides = [1, 1]} : vector<18x72xbf16> to vector<16x64xbf16>
    %c1 = arith.constant 1 : index
    %c0_6 = arith.constant 0 : index
    %c0_7 = arith.constant 0 : index
    %9 = vector.load %arg2[%c1, %c0_6, %c0_7] : memref<9x64x128xbf16, #tpu.memory_space<vmem>>, vector<1x64x128xbf16>
    %10 = vector.shape_cast %9 : vector<1x64x128xbf16> to vector<64x128xbf16>
    %cst_8 = arith.constant dense<0.000000e+00> : vector<16x128xf32>
    %11 = tpu.matmul %8, %10, %cst_8 {dimension_numbers = #tpu.dot_dimension_numbers<[1], [0], [0], [1], [0, 0, 1, 1], [], []>} : vector<16x64xbf16>, vector<64x128xbf16>, vector<16x128xf32> -> vector<16x128xf32>
    %12 = arith.addf %7, %11 : vector<16x128xf32>
    %13 = vector.extract_strided_slice %1 {offsets = [0, 8], sizes = [16, 64], strides = [1, 1]} : vector<18x72xbf16> to vector<16x64xbf16>
    %c2 = arith.constant 2 : index
    %c0_9 = arith.constant 0 : index
    %c0_10 = arith.constant 0 : index
    %14 = vector.load %arg2[%c2, %c0_9, %c0_10] : memref<9x64x128xbf16, #tpu.memory_space<vmem>>, vector<1x64x128xbf16>
    %15 = vector.shape_cast %14 : vector<1x64x128xbf16> to vector<64x128xbf16>
    %cst_11 = arith.constant dense<0.000000e+00> : vector<16x128xf32>
    %16 = tpu.matmul %13, %15, %cst_11 {dimension_numbers = #tpu.dot_dimension_numbers<[1], [0], [0], [1], [0, 0, 1, 1], [], []>} : vector<16x64xbf16>, vector<64x128xbf16>, vector<16x128xf32> -> vector<16x128xf32>
    %17 = arith.addf %12, %16 : vector<16x128xf32>
    %18 = vector.extract_strided_slice %1 {offsets = [1, 0], sizes = [16, 64], strides = [1, 1]} : vector<18x72xbf16> to vector<16x64xbf16>
    %c3 = arith.constant 3 : index
    %c0_12 = arith.constant 0 : index
    %c0_13 = arith.constant 0 : index
    %19 = vector.load %arg2[%c3, %c0_12, %c0_13] : memref<9x64x128xbf16, #tpu.memory_space<vmem>>, vector<1x64x128xbf16>
    %20 = vector.shape_cast %19 : vector<1x64x128xbf16> to vector<64x128xbf16>
    %cst_14 = arith.constant dense<0.000000e+00> : vector<16x128xf32>
    %21 = tpu.matmul %18, %20, %cst_14 {dimension_numbers = #tpu.dot_dimension_numbers<[1], [0], [0], [1], [0, 0, 1, 1], [], []>} : vector<16x64xbf16>, vector<64x128xbf16>, vector<16x128xf32> -> vector<16x128xf32>
    %22 = arith.addf %17, %21 : vector<16x128xf32>
    %23 = vector.extract_strided_slice %1 {offsets = [1, 4], sizes = [16, 64], strides = [1, 1]} : vector<18x72xbf16> to vector<16x64xbf16>
    %c4 = arith.constant 4 : index
    %c0_15 = arith.constant 0 : index
    %c0_16 = arith.constant 0 : index
    %24 = vector.load %arg2[%c4, %c0_15, %c0_16] : memref<9x64x128xbf16, #tpu.memory_space<vmem>>, vector<1x64x128xbf16>
    %25 = vector.shape_cast %24 : vector<1x64x128xbf16> to vector<64x128xbf16>
    %cst_17 = arith.constant dense<0.000000e+00> : vector<16x128xf32>
    %26 = tpu.matmul %23, %25, %cst_17 {dimension_numbers = #tpu.dot_dimension_numbers<[1], [0], [0], [1], [0, 0, 1, 1], [], []>} : vector<16x64xbf16>, vector<64x128xbf16>, vector<16x128xf32> -> vector<16x128xf32>
    %27 = arith.addf %22, %26 : vector<16x128xf32>
    %28 = vector.extract_strided_slice %1 {offsets = [1, 8], sizes = [16, 64], strides = [1, 1]} : vector<18x72xbf16> to vector<16x64xbf16>
    %c5 = arith.constant 5 : index
    %c0_18 = arith.constant 0 : index
    %c0_19 = arith.constant 0 : index
    %29 = vector.load %arg2[%c5, %c0_18, %c0_19] : memref<9x64x128xbf16, #tpu.memory_space<vmem>>, vector<1x64x128xbf16>
    %30 = vector.shape_cast %29 : vector<1x64x128xbf16> to vector<64x128xbf16>
    %cst_20 = arith.constant dense<0.000000e+00> : vector<16x128xf32>
    %31 = tpu.matmul %28, %30, %cst_20 {dimension_numbers = #tpu.dot_dimension_numbers<[1], [0], [0], [1], [0, 0, 1, 1], [], []>} : vector<16x64xbf16>, vector<64x128xbf16>, vector<16x128xf32> -> vector<16x128xf32>
    %32 = arith.addf %27, %31 : vector<16x128xf32>
    %33 = vector.extract_strided_slice %1 {offsets = [2, 0], sizes = [16, 64], strides = [1, 1]} : vector<18x72xbf16> to vector<16x64xbf16>
    %c6 = arith.constant 6 : index
    %c0_21 = arith.constant 0 : index
    %c0_22 = arith.constant 0 : index
    %34 = vector.load %arg2[%c6, %c0_21, %c0_22] : memref<9x64x128xbf16, #tpu.memory_space<vmem>>, vector<1x64x128xbf16>
    %35 = vector.shape_cast %34 : vector<1x64x128xbf16> to vector<64x128xbf16>
    %cst_23 = arith.constant dense<0.000000e+00> : vector<16x128xf32>
    %36 = tpu.matmul %33, %35, %cst_23 {dimension_numbers = #tpu.dot_dimension_numbers<[1], [0], [0], [1], [0, 0, 1, 1], [], []>} : vector<16x64xbf16>, vector<64x128xbf16>, vector<16x128xf32> -> vector<16x128xf32>
    %37 = arith.addf %32, %36 : vector<16x128xf32>
    %38 = vector.extract_strided_slice %1 {offsets = [2, 4], sizes = [16, 64], strides = [1, 1]} : vector<18x72xbf16> to vector<16x64xbf16>
    %c7 = arith.constant 7 : index
    %c0_24 = arith.constant 0 : index
    %c0_25 = arith.constant 0 : index
    %39 = vector.load %arg2[%c7, %c0_24, %c0_25] : memref<9x64x128xbf16, #tpu.memory_space<vmem>>, vector<1x64x128xbf16>
    %40 = vector.shape_cast %39 : vector<1x64x128xbf16> to vector<64x128xbf16>
    %cst_26 = arith.constant dense<0.000000e+00> : vector<16x128xf32>
    %41 = tpu.matmul %38, %40, %cst_26 {dimension_numbers = #tpu.dot_dimension_numbers<[1], [0], [0], [1], [0, 0, 1, 1], [], []>} : vector<16x64xbf16>, vector<64x128xbf16>, vector<16x128xf32> -> vector<16x128xf32>
    %42 = arith.addf %37, %41 : vector<16x128xf32>
    %43 = vector.extract_strided_slice %1 {offsets = [2, 8], sizes = [16, 64], strides = [1, 1]} : vector<18x72xbf16> to vector<16x64xbf16>
    %c8 = arith.constant 8 : index
    %c0_27 = arith.constant 0 : index
    %c0_28 = arith.constant 0 : index
    %44 = vector.load %arg2[%c8, %c0_27, %c0_28] : memref<9x64x128xbf16, #tpu.memory_space<vmem>>, vector<1x64x128xbf16>
    %45 = vector.shape_cast %44 : vector<1x64x128xbf16> to vector<64x128xbf16>
    %cst_29 = arith.constant dense<0.000000e+00> : vector<16x128xf32>
    %46 = tpu.matmul %43, %45, %cst_29 {dimension_numbers = #tpu.dot_dimension_numbers<[1], [0], [0], [1], [0, 0, 1, 1], [], []>} : vector<16x64xbf16>, vector<64x128xbf16>, vector<16x128xf32> -> vector<16x128xf32>
    %47 = arith.addf %42, %46 : vector<16x128xf32>
    %c0_30 = arith.constant 0 : index
    %c0_31 = arith.constant 0 : index
    %48 = vector.load %arg3[%c0_30, %c0_31] : memref<1x128xf32, #tpu.memory_space<vmem>>, vector<1x128xf32>
    %49 = vector.broadcast %48 : vector<1x128xf32> to vector<16x128xf32>
    %50 = arith.addf %47, %49 : vector<16x128xf32>
    %cst_32 = arith.constant 0.000000e+00 : f32
    %51 = vector.broadcast %cst_32 : f32 to vector<16x128xf32>
    %52 = arith.maximumf %50, %51 : vector<16x128xf32>
    %53 = vector.extract_strided_slice %52 {offsets = [0, 0], sizes = [8, 128], strides = [1, 1]} : vector<16x128xf32> to vector<8x128xf32>
    %54 = vector.extract_strided_slice %52 {offsets = [8, 0], sizes = [8, 128], strides = [1, 1]} : vector<16x128xf32> to vector<8x128xf32>
    %55 = arith.addf %53, %54 : vector<8x128xf32>
    %cst_33 = arith.constant dense<0.000000e+00> : vector<128xf32>
    %56 = vector.multi_reduction <add>, %55, %cst_33 [0] : vector<8x128xf32> to vector<128xf32>
    %57 = vector.shape_cast %56 : vector<128xf32> to vector<1x128xf32>
    %58 = vector.shape_cast %57 : vector<1x128xf32> to vector<1x1x128xf32>
    %c0_34 = arith.constant 0 : index
    %c0_35 = arith.constant 0 : index
    %c0_36 = arith.constant 0 : index
    %59 = vector.load %arg4[%c0_34, %c0_35, %c0_36] : memref<1x1x128xf32, #tpu.memory_space<vmem>>, vector<1x1x128xf32>
    tpu.vector_store %arg4[%c0_34, %c0_35, %c0_36], %58 {strides = array<i32>} : memref<1x1x128xf32, #tpu.memory_space<vmem>>, vector<1x1x128xf32>,
    return
  }
  func.func @transform_0(%arg0: i32) -> (i32, i32, i32) {
    %c0_i32 = arith.constant 0 : i32
    %c0_i32_0 = arith.constant 0 : i32
    %c0_i32_1 = arith.constant 0 : i32
    return %arg0, %c0_i32, %c0_i32_0 : i32, i32, i32
  }
  func.func @transform_1(%arg0: i32) -> (i32, i32, i32) {
    %c0_i32 = arith.constant 0 : i32
    %c0_i32_0 = arith.constant 0 : i32
    %c0_i32_1 = arith.constant 0 : i32
    %c0_i32_2 = arith.constant 0 : i32
    return %c0_i32, %c0_i32_0, %c0_i32_1 : i32, i32, i32
  }
  func.func @transform_2(%arg0: i32) -> (i32, i32) {
    %c0_i32 = arith.constant 0 : i32
    %c0_i32_0 = arith.constant 0 : i32
    %c0_i32_1 = arith.constant 0 : i32
    return %c0_i32, %c0_i32_0 : i32, i32
  }
  func.func @transform_3(%arg0: i32) -> (i32, i32, i32) {
    %c0_i32 = arith.constant 0 : i32
    %c0_i32_0 = arith.constant 0 : i32
    %c0_i32_1 = arith.constant 0 : i32
    return %arg0, %c0_i32, %c0_i32_0 : i32, i32, i32
  }
}

</mosaic_0001>

<bundles_post_ra>
// kernel: custom_hf_model_forward.3
= control target key start
LH: loop header
LB: loop body
LE: loop exit
PB: predicated region body
PF: predicated region fallthrough
CT: control target
= control target key end

     0   :  { %s179_s0 = inlined_call_operand.vmem [shape: f32[2,128], index: 0, kind: input, shape index: {}]   ;;  %s180_s1 = inlined_call_operand.vmem [shape: f32[128,128], index: 1, kind: input, shape index: {}]   ;;  %s181_s2 = inlined_call_operand.vmem [shape: f32[1,128], index: 2, kind: input, shape index: {}]   ;;  %s182_s3 = inlined_call_operand.hbm [shape: f32[2,128], index: 3, kind: output, shape index: {}]  }
   0x1   :  { %v31_v0 = vld [vmem:[%s180_s1 + $0x78] sm:$0xff]  ;;  %v30_v1 = vld [vmem:[%s180_s1 + $0x70] sm:$0xff]  ;;  %v29_v2 = vld [vmem:[%s180_s1 + $0x68] sm:$0xff] }
   0x2   :  { %36 = vmatpush.msra.mxu0 %v31_v0  ;;  %v28_v3 = vld [vmem:[%s180_s1 + $0x60] sm:$0xff]  ;;  %v27_v4 = vld [vmem:[%s180_s1 + $0x58] sm:$0xff] }
   0x4   :  { %37 = vmatpush.msra.mxu0 %v30_v1 }
   0x6   :  { %38 = vmatpush.msra.mxu0 %v29_v2 }
   0x7   :  { %8 = vsyncpa [#allocation3], 0  ;;  %v26_v5 = vld [vmem:[%s180_s1 + $0x50] sm:$0xff]  ;;  %v25_v6 = vld [vmem:[%s180_s1 + $0x48] sm:$0xff]  ;;  %s101_s21 = smov [#allocation2]   ;;  %s64_s25 = sshll.u32 %s182_s3, 4  ;;  %s65_s25 = int_to_ptr.hbm [resolvable:$true] %s64_s25 }
   0x8   :  { %39 = vmatpush.msra.mxu0 %v28_v3  ;;  %v24_v7 = vld [vmem:[%s180_s1 + $0x40] sm:$0xff]  ;;  %v23_v8 = vld [vmem:[%s180_s1 + $0x38] sm:$0xff]  ;;  %v22_v9 = vld [vmem:[%s180_s1 + $0x30] sm:$0xff]  ;;  %s62_s22 = sshll.u32 %s101_s21, 4  ;;  %s63_s22 = int_to_ptr.vmem [resolvable:$true] %s62_s22 }
   0x9   :  { %v21_v10 = vld [vmem:[%s180_s1 + $0x28] sm:$0xff]  ;;  %v20_v11 = vld [vmem:[%s180_s1 + $0x20] sm:$0xff]  ;;  %v19_v12 = vld [vmem:[%s180_s1 + $0x18] sm:$0xff] }
   0xa   :  { %40 = vmatpush.msra.mxu0 %v27_v4  ;;  %v18_v13 = vld [vmem:[%s180_s1 + $0x10] sm:$0xff]  ;;  %v17_v14 = vld [vmem:[%s180_s1 + $0x8] sm:$0xff]  ;;  %v16_v15 = vld [vmem:[%s180_s1] sm:$0xff] }
   0xb   :  { %v15_v16 = vld [vmem:[%s179_s0] sm:$0x3] }
   0xc   :  { %41 = vmatpush.msra.mxu0 %v26_v5  ;;  %v74_v17 = vld [vmem:[%s181_s2] ss:$0 sm:$0xff] }
   0xe   :  { %42 = vmatpush.msra.mxu0 %v25_v6 }
  0x10   :  { %43 = vmatpush.msra.mxu0 %v24_v7 }
  0x12   :  { %44 = vmatpush.msra.mxu0 %v23_v8 }
  0x14   :  { %45 = vmatpush.msra.mxu0 %v22_v9 }
  0x16   :  { %46 = vmatpush.msra.mxu0 %v21_v10 }
  0x18   :  { %47 = vmatpush.msra.mxu0 %v20_v11 }
  0x1a   :  { %48 = vmatpush.msra.mxu0 %v19_v12 }
  0x1c   :  { %49 = vmatpush.msra.mxu0 %v18_v13 }
  0x1e   :  { %50 = vmatpush.msra.mxu0 %v17_v14 }
  0x20   :  { %51 = vmatpush.msra.mxu0 %v16_v15 }
  0x21   :  { %52 = vmatmul.f32.vlgmr.msra.gmra.mxu0 %v15_v16 }
  0x9e   :  { %v53_v18 = vpop.f32.mrf.mxu0 }
  0x9f   :  { %v54_v19 = vadd.f32 %v74_v17, %v53_v18 }
  0xa1   :  { %56 = vst [vmem:[#allocation2] sm:$0x3] %v54_v19 }
  0xa2   :  { %67 = dma.vmem_to_hbm [thread:$0]  %s63_s22, 32, %s65_s25, [#allocation3]  }
  0xa3   :  { %99 = dma.done.wait [#allocation3], 32  }
  0xa4   :  { %100 = vsyncadd [#allocation3], 4294967264 }
  0xa5   :  { %72 = vsyncpa [#allocation3], 1 }

// kernel: custom_hf_model_forward.2
= control target key start
LH: loop header
LB: loop body
LE: loop exit
PB: predicated region body
PF: predicated region fallthrough
CT: control target
= control target key end

     0   :  { %s1042_s12 = smov 0   ;;  %s1183_s0 = inlined_call_operand.vmem [shape: bf16[2,18,72], index: 0, kind: input, shape index: {}]   ;;  %s1184_s1 = inlined_call_operand.vmem [shape: bf16[9,64,128], index: 1, kind: input, shape index: {}]   ;;  %s1185_s2 = inlined_call_operand.vmem [shape: f32[1,128], index: 2, kind: input, shape index: {}]   ;;  %s1186_s3 = inlined_call_operand.vmem [shape: f32[2,1,128], index: 3, kind: output, shape index: {}]  }
   0x1 LB: > { %s734_s13 = sadd.s32 4294967295, %s1018_s12   ;;  %p738_p0 = scmp.ge.s32.totalorder %s1018_s12, 1  ;;  %s1018_s12 = sphi %s1042_s12, %s13_s12  }
   0x2   : > { %p137_p1 = scmp.lt.s32.totalorder %s1018_s12, 3 }
   0x4   : > { %p138_p2 = pnand %p738_p0, %p137_p1 }
   0x5   : > { %p159_p3 = scmp.lt.s32.totalorder (!%p138_p2), %s734_s13, 1  ;;  %s1020_s15 = smov (!%p138_p2), 124  }
   0x6   : > { %141 = sbr.rel (%p138_p2) target bundleno = 320 (0x140), region = 32  ;;  %s1021_s22 = smov (!%p138_p2), 120  }
   0xb   : > { %v971_v0 = vld [vmem:[%s1184_s1 + $0x38] sm:$0xff]  ;;  %s1188_s13 = smov (!%p159_p3, %s734_s13), 1  ;;  %v970_v3 = vld [vmem:[%s1184_s1 + $0x30] sm:$0xff]  ;;  %v969_v8 = vld [vmem:[%s1184_s1 + $0x28] sm:$0xff]  ;;  %vm344_vm0 = vsmask.f32 7424 }
   0xc   : > { %v967_v1 = vld [vmem:[%s1184_s1 + $0x18] sm:$0xff]  ;;  %227 = vmatpush.bf16.msra.mxu0 %v971_v0  ;;  %v966_v4 = vld [vmem:[%s1184_s1 + $0x10] sm:$0xff]  ;;  %s1000_s28 = smul.u32 12, %s1188_s13  ;;  %v965_v9 = vld [vmem:[%s1184_s1 + $0x8] sm:$0xff]  ;;  %vm516_vm1 = vcmask 1046528   ;;  %vm219_vm2 = vcmask 523264   ;;  %s166_s21 = scalar_lea.vmem %s1186_s3, %s1188_s13 }
   0xd   : > { %v979_v2 = vld [vmem:[%s1184_s1 + $0x78] sm:$0xff]  ;;  %268 = vmatpush.bf16.msra.mxu1 %v967_v1  ;;  %v978_v5 = vld [vmem:[%s1184_s1 + $0x70] sm:$0xff]  ;;  %v977_v12 = vld [vmem:[%s1184_s1 + $0x68] sm:$0xff] }
   0xe   : > { %387 = vmatpush.bf16.msra.mxu3 %v979_v2  ;;  %v975_v6 = vld [vmem:[%s1184_s1 + $0x58] sm:$0xff]  ;;  %v974_v7 = vld [vmem:[%s1184_s1 + $0x50] sm:$0xff]  ;;  %s163_s6 = scalar_lea.vmem %s1183_s0, %s1000_s28  ;;  %v968_v17 = vld [vmem:[%s1184_s1 + $0x20] sm:$0xff] }
   0xf   : > { %320 = vmatpush.bf16.msra.mxu2 %v975_v6  ;;  %v963_v10 = vld [vmem:[%s163_s6] sm:$0xff]  ;;  %v170_v11 = vld [vmem:[%s163_s6 + $0x8] sm:$0x1]  ;;  %v983_v29 = vld [vmem:[%s1184_s1 + $0x98] sm:$0xff] }
  0x10   : > { %228 = vmatpush.bf16.msra.mxu0 %v970_v3  ;;  %v342_v13 = vunpack.c.l.b16 %v170_v11  ;;  %193 = vrot.lane.b32.xlu0 %v963_v10, %s1020_s15  ;;  %v345_v14 = vshrl.u32 %v963_v10, 16  ;;  %v347_v15 = vshll.u32 %v963_v10, 16  ;;  %v964_v19 = vld [vmem:[%s1184_s1] sm:$0xff]  ;;  %v517_v25 = vrot.slane %v963_v10, 1  ;;  %v973_v28 = vld [vmem:[%s1184_s1 + $0x48] sm:$0xff]  ;;  %v987_v30 = vld [vmem:[%s1184_s1 + $0xb8] sm:$0xff] }
  0x11   : > { %269 = vmatpush.bf16.msra.mxu1 %v966_v4  ;;  %v976_v20 = vld [vmem:[%s1184_s1 + $0x60] sm:$0xff]  ;;  %v995_v31 = vld [vmem:[%s1184_s1 + $0xf8] sm:$0xff]  ;;  %v982_v33 = vld [vmem:[%s1184_s1 + $0x90] sm:$0xff] }
  0x12   : > { %388 = vmatpush.bf16.msra.mxu3 %v978_v5  ;;  %v343_v16 = vpack.c.b16 %v342_v13, %v342_v13  ;;  %v349_v18 = vrot.slane %v347_v15, 1  ;;  %v972_v32 = vld [vmem:[%s1184_s1 + $0x40] sm:$0xff]  ;;  %v986_v34 = vld [vmem:[%s1184_s1 + $0xb0] sm:$0xff]  ;;  %v991_v36 = vld [vmem:[%s1184_s1 + $0xd8] sm:$0xff] }
  0x13   : > { %321 = vmatpush.bf16.msra.mxu2 %v974_v7  ;;  %v994_v35 = vld [vmem:[%s1184_s1 + $0xf0] sm:$0xff]  ;;  %v981_v37 = vld [vmem:[%s1184_s1 + $0x88] sm:$0xff]  ;;  %v980_v41 = vld [vmem:[%s1184_s1 + $0x80] sm:$0xff] }
  0x14   : > { %229 = vmatpush.bf16.msra.mxu0 %v969_v8  ;;  %v352_v21 = vshll.u32 %v343_v16, 16  ;;  %v350_v22 = vor.u32 %v349_v18, %v345_v14  ;;  %v518_v26 = vrot.slane %v343_v16, 1  ;;  %v985_v38 = vld [vmem:[%s1184_s1 + $0xa8] sm:$0xff]  ;;  %v990_v40 = vld [vmem:[%s1184_s1 + $0xd0] sm:$0xff]  ;;  %v984_v42 = vld [vmem:[%s1184_s1 + $0xa0] sm:$0xff] }
  0x15   : > { %270 = vmatpush.bf16.msra.mxu1 %v965_v9  ;;  %v993_v39 = vld [vmem:[%s1184_s1 + $0xe8] sm:$0xff]  ;;  %v992_v43 = vld [vmem:[%s1184_s1 + $0xe0] sm:$0xff]  ;;  %v999_v47 = vld [vmem:[%s1184_s1 + $0x118] sm:$0xff] }
  0x16   : > { %389 = vmatpush.bf16.msra.mxu3 %v977_v12  ;;  %v354_v23 = vrot.slane %v352_v21, 1  ;;  %v519_v27 = vsel %vm516_vm1, %v517_v25, %v518_v26  ;;  %v989_v44 = vld [vmem:[%s1184_s1 + $0xc8] sm:$0xff]  ;;  %v988_v46 = vld [vmem:[%s1184_s1 + $0xc0] sm:$0xff]  ;;  %v998_v49 = vld [vmem:[%s1184_s1 + $0x110] sm:$0xff] }
  0x17   : > { %322 = vmatpush.bf16.msra.mxu2 %v973_v28  ;;  %v997_v50 = vld [vmem:[%s1184_s1 + $0x108] sm:$0xff]  ;;  %v996_v53 = vld [vmem:[%s1184_s1 + $0x100] sm:$0xff] }
  0x18   : > { %230 = vmatpush.bf16.msra.mxu0 %v968_v17  ;;  %v355_v24 = vsel %vm344_vm0, %v350_v22, %v354_v23  ;;  %287 = vrot.lane.b32.xlu0 %v963_v10, %s1021_s22  ;;  %v1011_v21 = vld [vmem:[%s1185_s2] ss:$0 sm:$0xff] }
  0x19   : > { %271 = vmatpush.bf16.msra.mxu1 %v964_v19  ;;  %408 = vrot.lane.b32.xlu1 %v355_v24, %s1020_s15 }
  0x1a   : > { %390 = vmatpush.bf16.msra.mxu3 %v976_v20  ;;  %462 = vrot.lane.b32.xlu2 %v355_v24, %s1021_s22 }
  0x1b   : > { %323 = vmatpush.bf16.msra.mxu2 %v972_v32 }
  0x1c   : > { %785 = vmatmul.msk.bf16.vlgmr.msra.gmra.mxu1 %vm219_vm2, %v963_v10  ;;  %441 = vmatpush.bf16.msrb.mxu0 %v983_v29 }
  0x1d   : > { %835 = vmatmul.msk.bf16.vlgmr.msra.gmra.mxu3 %vm219_vm2, %v355_v24  ;;  %495 = vmatpush.bf16.msrb.mxu1 %v987_v30 }
  0x1e   : > { %605 = vmatpush.bf16.msrb.mxu3 %v995_v31 }
  0x1f   : > { %551 = vmatpush.bf16.msrb.mxu2 %v991_v36 }
  0x20   : > { %442 = vmatpush.bf16.msrb.mxu0 %v982_v33 }
  0x21   : > { %572 = vrot.lane.b32.xlu1 %v519_v27, %s1020_s15  ;;  %496 = vmatpush.bf16.msrb.mxu1 %v986_v34 }
  0x22   : > { %626 = vrot.lane.b32.xlu2 %v519_v27, %s1021_s22  ;;  %606 = vmatpush.bf16.msrb.mxu3 %v994_v35 }
  0x23   : > { %552 = vmatpush.bf16.msrb.mxu2 %v990_v40 }
  0x24   : > { %443 = vmatpush.bf16.msrb.mxu0 %v981_v37 }
  0x25   : > { %497 = vmatpush.bf16.msrb.mxu1 %v985_v38 }
  0x26   : > { %607 = vmatpush.bf16.msrb.mxu3 %v993_v39 }
  0x27   : > { %553 = vmatpush.bf16.msrb.mxu2 %v989_v44 }
  0x28   : > { %444 = vmatpush.bf16.msrb.mxu0 %v980_v41 }
  0x29   : > { %498 = vmatpush.bf16.msrb.mxu1 %v984_v42 }
  0x2a   : > { %608 = vmatpush.bf16.msrb.mxu3 %v992_v43 }
  0x2b   : > { %554 = vmatpush.bf16.msrb.mxu2 %v988_v46 }
  0x74   : > { %v463_v45 = vpop.permute.xlu2 %462 }
  0x75   : > { %885 = vmatmul.msk.bf16.vlgmr.msrb.gmra.mxu1 %vm219_vm2, %v463_v45 }
  0x7c   : > { %v627_v55 = vpop.permute.xlu2 %626 }
  0x82   : > { %v194_v48 = vpop.permute.xlu0 %193 }
  0x83   : > { %768 = vmatmul.msk.bf16.vlgmr.msra.gmra.mxu0 %vm219_vm2, %v194_v48 }
  0x84   : > { %659 = vmatpush.bf16.msra.mxu0 %v999_v47 }
  0x88   : > { %660 = vmatpush.bf16.msra.mxu0 %v998_v49 }
  0x8a   : > { %v288_v51 = vpop.permute.xlu0 %287 }
  0x8b   : > { %v409_v52 = vpop.permute.xlu1 %408  ;;  %810 = vmatmul.msk.bf16.vlgmr.msra.gmra.mxu2 %vm219_vm2, %v288_v51 }
  0x8c   : > { %661 = vmatpush.bf16.msra.mxu0 %v997_v50 }
  0x90   : > { %662 = vmatpush.bf16.msra.mxu0 %v996_v53 }
  0x93   : > { %v573_v54 = vpop.permute.xlu1 %572  ;;  %860 = vmatmul.msk.bf16.vlgmr.msrb.gmra.mxu0 %vm219_vm2, %v409_v52 }
  0x94   : > { %935 = vmatmul.msk.bf16.vlgmr.msrb.gmra.mxu3 %vm219_vm2, %v573_v54 }
  0x99   : > { %v273_v57 = vpop.f32.mrf.mxu1 }
  0x9b   : > { %910 = vmatmul.msk.bf16.vlgmr.msrb.gmra.mxu2 %vm219_vm2, %v519_v27 }
  0xa0   : > { %v392_v59 = vpop.f32.mrf.mxu3 }
  0xa1   : > { %v275_v0 = vpop.f32.mrf.mxu1 }
  0xa3   : > { %960 = vmatmul.msk.bf16.vlgmr.msra.gmra.mxu0 %vm219_vm2, %v627_v55 }
  0xa8   : > { %v394_v1 = vpop.f32.mrf.mxu3 }
  0xf2   : > { %v500_v8 = vpop.f32.mrf.mxu1 }
  0xfa   : > { %v502_v17 = vpop.f32.mrf.mxu1 }
 0x100   : > { %v232_v56 = vpop.f32.mrf.mxu0 }
 0x101   : > { %v274_v61 = vadd.f32 %v273_v57, %v232_v56 }
 0x108   : > { %v234_v58 = vpop.f32.mrf.mxu0 }
 0x109   : > { %v276_v4 = vadd.f32 %v275_v0, %v234_v58 }
 0x10e   : > { %v325_v60 = vpop.f32.mrf.mxu2 }
 0x10f   : > { %v330_v63 = vadd.f32 %v325_v60, %v274_v61 }
 0x110   : > { %v446_v62 = vpop.f32.mrf.mxu0 }
 0x111   : > { %v397_v2 = vadd.f32 %v392_v59, %v330_v63 }
 0x113   : > { %v451_v6 = vadd.f32 %v446_v62, %v397_v2 }
 0x115   : > { %v505_v9 = vadd.f32 %v500_v8, %v451_v6 }
 0x116   : > { %v327_v3 = vpop.f32.mrf.mxu2 }
 0x117   : > { %v331_v7 = vadd.f32 %v327_v3, %v276_v4  ;;  %v610_v11 = vpop.f32.mrf.mxu3 }
 0x118   : > { %v448_v5 = vpop.f32.mrf.mxu0 }
 0x119   : > { %v398_v10 = vadd.f32 %v394_v1, %v331_v7 }
 0x11b   : > { %v452_v15 = vadd.f32 %v448_v5, %v398_v10 }
 0x11d   : > { %v506_v18 = vadd.f32 %v502_v17, %v452_v15 }
 0x11e   : > { %v556_v12 = vpop.f32.mrf.mxu2 }
 0x11f   : > { %v561_v13 = vadd.f32 %v556_v12, %v505_v9  ;;  %v612_v23 = vpop.f32.mrf.mxu3 }
 0x120   : > { %v664_v14 = vpop.f32.mrf.mxu0 }
 0x121   : > { %v615_v16 = vadd.f32 %v610_v11, %v561_v13 }
 0x123   : > { %v669_v20 = vadd.f32 %v664_v14, %v615_v16 }
 0x125   : > { %v675_v26 = vadd.f32 %v1011_v21, %v669_v20 }
 0x126   : > { %v558_v19 = vpop.f32.mrf.mxu2 }
 0x127   : > { %v562_v22 = vadd.f32 %v558_v19, %v506_v18  ;;  %v677_v29 = vmax.f32 %v675_v26, 0.0 }
 0x128   : > { %v666_v25 = vpop.f32.mrf.mxu0 }
 0x129   : > { %v616_v24 = vadd.f32 %v612_v23, %v562_v22 }
 0x12b   : > { %v670_v27 = vadd.f32 %v666_v25, %v616_v24 }
 0x12d   : > { %v676_v28 = vadd.f32 %v1011_v21, %v670_v27 }
 0x12f   : > { %v678_v30 = vmax.f32 %v676_v28, 0.0 }
 0x131   : > { %v679_v31 = vadd.f32 %v678_v30, %v677_v29 }
 0x133   : > { %v680_v32 = vrot.slane %v679_v31, 4 }
 0x135   : > { %v681_v33 = vadd.f32 %v680_v32, %v679_v31 }
 0x137   : > { %v682_v34 = vrot.slane %v681_v33, 2 }
 0x139   : > { %v683_v35 = vadd.f32 %v682_v34, %v681_v33 }
 0x13b   : > { %v684_v36 = vrot.slane %v683_v35, 1 }
 0x13d   : > { %v685_v37 = vadd.f32 %v684_v36, %v683_v35 }
 0x13f   : > { %686 = vst [vmem:[%s166_s21] sm:$0x1] %v685_v37 }
 0x140 PF: > { %s13_s12 = sadd.s32 1, %s1018_s12  }
 0x141   : > { %p10_p4 = scmp.ge.s32.totalorder %s13_s12, 4  }
 0x143   :  { %12 = sbr.rel (!%p10_p4) target bundleno = 1 (0x1), region = 70 }

</bundles_post_ra>
